<compile_context>
chip_gen: v7x
topology: tpu7x:2x2x1
jax: 0.10.0
libtpu: 0.0.40
codegen_flags: <defaults>
</compile_context>

<pallas_src>
import functools

import jax
import jax.numpy as jnp
import numpy as np
from jax.experimental import pallas as pl
from jax.experimental.pallas import tpu as pltpu


def _residual_block_kernel(x_ref, head_ref, c_ref,
                           wx_ref, ws_ref, wc_ref, bfg_ref,
                           wo_ref, bo_ref, out_ref, *,
                           channels, halo, time_tile):
    C = channels
    x = x_ref[0]            # (C, tT)   current tap x[t]           (bf16)
    head = head_ref[0, 0]   # (C, halo) columns x[t0-d .. ]        (bf16)
    cnd = c_ref[0]          # (Dc, tT)  interpolated conditioning  (bf16)

    # Shifted tap x[t - d] for this tile: halo head + in-tile prefix.
    if halo < time_tile:
        xs = jnp.concatenate([head, x[:, :time_tile - halo]], axis=-1)
    else:  # dilation >= tile width: the whole shifted window precedes the tile
        xs = head

    # Fused filter+gate branches (rows = [filter; gate]), f32 accumulation.
    fg = (bfg_ref[...]
          + jnp.dot(wx_ref[...], x, preferred_element_type=jnp.float32)
          + jnp.dot(ws_ref[...], xs, preferred_element_type=jnp.float32)
          + jnp.dot(wc_ref[...], cnd, preferred_element_type=jnp.float32))
    f = fg[:C]
    g = fg[C:]

    # tanh on EUP; sigmoid as exp + approx reciprocal (EUP slot, VPU stays free)
    z = jnp.tanh(f) * pl.reciprocal(1.0 + jnp.exp(-g), approx=True)

    out = (jnp.dot(wo_ref[...], z.astype(wo_ref.dtype),
                   preferred_element_type=jnp.float32) + bo_ref[...])
    out_ref[0] = (x.astype(jnp.float32) + out).astype(out_ref.dtype)


def _pick_time_tile(T):
    # Biggest lane-aligned tile that divides T; fall back to the full dim.
    for t in (2048, 1024, 512, 256, 128):
        if T % t == 0:
            return t
    return T


def residual_block(x, cond, params, dilation, *, time_tile=None,
                   compute_dtype=jnp.bfloat16):
    """x: (B, C, T) f32, cond: (B, Dc, Tc) f32 -> (B, C, T) f32."""
    B, C, T = x.shape
    _, Dc, Tc = cond.shape
    d = int(dilation)
    assert d >= 1

    tT = _pick_time_tile(T) if time_tile is None else int(time_tile)
    assert T % tT == 0, "time_tile must divide T"
    nT = T // tT
    h = min(d, tT)

    x_c = x.astype(compute_dtype)
    cond_c = cond.astype(compute_dtype)

    # glue: F.interpolate(cond, size=T+d, mode='nearest'); only the first T
    # positions survive the final crop.  Integer index math (no f32 drift).
    src = (np.arange(T, dtype=np.int64) * Tc) // (T + d)
    src = np.clip(src, 0, Tc - 1).astype(np.int32)
    cond_i = cond_c[:, :, jnp.asarray(src)]                       # (B, Dc, T)

    # glue: per-tile halo heads, heads[b, i] = x[b, :, i*tT-d : i*tT-d+h]
    # (zeros where the index is negative).  Tiny: B*nT*C*h elements.
    starts = np.arange(nT, dtype=np.int64) * tT - d
    idx = starts[:, None] + np.arange(h, dtype=np.int64)[None, :]   # (nT, h)
    valid = idx >= 0
    idx_c = np.where(valid, idx, 0).astype(np.int32)
    heads = x_c[:, :, jnp.asarray(idx_c)]                         # (B, C, nT, h)
    heads = jnp.where(jnp.asarray(valid)[None, None], heads,
                      jnp.zeros((), compute_dtype))
    heads = jnp.transpose(heads, (0, 2, 1, 3))                    # (B, nT, C, h)

    # Weight packing: rows [filter; gate]; three column slabs, one per input
    # tap, passed as separate operands so the kernel never slices a weight Ref.
    wf, wg = params["filter_w"], params["gate_w"]
    w_x = jnp.concatenate([wf[:, :, 1], wg[:, :, 1]], axis=0)     # x[t]   tap
    w_s = jnp.concatenate([wf[:, :, 0], wg[:, :, 0]], axis=0)     # x[t-d] tap
    w_c = jnp.concatenate([params["cond_filter_w"][:, :, 0],
                           params["cond_gate_w"][:, :, 0]], axis=0)
    w_x = w_x.astype(compute_dtype)                               # (2C, C)
    w_s = w_s.astype(compute_dtype)                               # (2C, C)
    w_c = w_c.astype(compute_dtype)                               # (2C, Dc)
    b_fg = jnp.concatenate(
        [params["filter_b"] + params["cond_filter_b"],
         params["gate_b"] + params["cond_gate_b"]]).reshape(2 * C, 1)
    b_fg = b_fg.astype(jnp.float32)
    w_o = params["out_w"][:, :, 0].astype(compute_dtype)          # (C, C)
    b_o = params["out_b"].reshape(C, 1).astype(jnp.float32)

    kernel = functools.partial(_residual_block_kernel,
                               channels=C, halo=h, time_tile=tT)

    act = jnp.dtype(compute_dtype).itemsize
    cost = pl.CostEstimate(
        flops=2 * B * T * (2 * C * (2 * C + Dc) + C * C),
        transcendentals=3 * B * C * T,
        bytes_accessed=(x_c.size + cond_i.size + heads.size) * act
                       + B * C * T * 4
                       + (w_x.size + w_s.size + w_c.size + w_o.size) * act
                       + 3 * C * 4)

    tile_spec = pl.BlockSpec((1, C, tT), lambda b, t: (b, 0, t))
    cond_spec = pl.BlockSpec((1, Dc, tT), lambda b, t: (b, 0, t))
    head_spec = pl.BlockSpec((1, 1, C, h), lambda b, t: (b, t, 0, 0))

    def full(shape):
        return pl.BlockSpec(shape, lambda b, t: (0,) * len(shape))

    return pl.pallas_call(
        kernel,
        out_shape=jax.ShapeDtypeStruct((B, C, T), jnp.float32),
        grid=(B, nT),
        in_specs=[tile_spec, head_spec, cond_spec,
                  full((2 * C, C)), full((2 * C, C)), full((2 * C, Dc)),
                  full((2 * C, 1)), full((C, C)), full((C, 1))],
        out_specs=tile_spec,
        compiler_params=pltpu.CompilerParams(
            dimension_semantics=("parallel", "parallel")),
        cost_estimate=cost,
    )(x_c, heads, cond_i, w_x, w_s, w_c, b_fg, w_o, b_o)


def reference(x, cond, params, dilation):
    """Pure-JAX f32 replica of the PyTorch forward (incl. negative-pad crop)."""
    d = dilation

    def conv1d(inp, w, b, dil, pad):
        out = jax.lax.conv_general_dilated(
            inp, w, window_strides=(1,), padding=[(pad, pad)],
            rhs_dilation=(dil,), dimension_numbers=("NCH", "OIH", "NCH"))
        return out + b[None, :, None]

    f_x = conv1d(x, params["filter_w"], params["filter_b"], d, d)
    g_x = conv1d(x, params["gate_w"], params["gate_b"], d, d)
    L = f_x.shape[-1]
    Tc = cond.shape[-1]
    src = np.clip((np.arange(L, dtype=np.int64) * Tc) // L, 0, Tc - 1)
    cond_interp = cond[:, :, jnp.asarray(src.astype(np.int32))]
    f = f_x + conv1d(cond_interp, params["cond_filter_w"],
                     params["cond_filter_b"], 1, 0)
    g = g_x + conv1d(cond_interp, params["cond_gate_w"],
                     params["cond_gate_b"], 1, 0)
    z = jnp.tanh(f) * jax.nn.sigmoid(g)
    out = conv1d(z, params["out_w"], params["out_b"], 1, 0)
    out = out[:, :, :x.shape[-1]]   # F.pad with negative pad == crop
    return x + out


if __name__ == "__main__":
    def run_case(case_idx, B, C, T, Dc, dilation, time_tile):
        key = jax.random.fold_in(jax.random.PRNGKey(0), case_idx)
        ks = jax.random.split(key, 12)
        params = {
            "filter_w":      jax.random.normal(ks[0], (C, C, 2), jnp.float32) * 0.3,
            "filter_b":      jax.random.normal(ks[1], (C,), jnp.float32) * 0.1,
            "gate_w":        jax.random.normal(ks[2], (C, C, 2), jnp.float32) * 0.3,
            "gate_b":        jax.random.normal(ks[3], (C,), jnp.float32) * 0.1,
            "cond_filter_w": jax.random.normal(ks[4], (C, Dc, 1), jnp.float32) * 0.3,
            "cond_filter_b": jax.random.normal(ks[5], (C,), jnp.float32) * 0.1,
            "cond_gate_w":   jax.random.normal(ks[6], (C, Dc, 1), jnp.float32) * 0.3,
            "cond_gate_b":   jax.random.normal(ks[7], (C,), jnp.float32) * 0.1,
            "out_w":         jax.random.normal(ks[8], (C, C, 1), jnp.float32) * 0.3,
            "out_b":         jax.random.normal(ks[9], (C,), jnp.float32) * 0.1,
        }
        x = jax.random.normal(ks[10], (B, C, T), jnp.float32)
        cond = jax.random.normal(ks[11], (B, Dc, T), jnp.float32)

        y = residual_block(x, cond, params, dilation, time_tile=time_tile)
        jax.block_until_ready(y)
        assert y.shape == (B, C, T)

        # Reference fed the same bf16-rounded activations / matmul weights the
        # kernel consumes; remaining deltas are accumulation order and EUP
        # transcendental approximations (well inside the tolerance below).
        rb = lambda a: a.astype(jnp.bfloat16).astype(jnp.float32)
        params_r = {k: (rb(v) if k.endswith("_w") else v)
                    for k, v in params.items()}
        y_ref = reference(rb(x), rb(cond), params_r, dilation)
        err = float(jnp.max(jnp.abs(y - y_ref)))
        assert jnp.allclose(y, y_ref, atol=3e-2, rtol=3e-2), \
            f"mismatch vs reference (max abs err {err})"

    # small demo shapes (single time tile, full-dim blocks)
    run_case(0, B=2, C=4, T=16, Dc=8, dilation=2, time_tile=None)
    # exercises time tiling + cross-tile halo for the dilated tap
    run_case(1, B=2, C=8, T=256, Dc=8, dilation=4, time_tile=128)
    print("KERNEL_OK")
</pallas_src>

<mosaic_0001>
module attributes {stable_mosaic.version = 11 : i64} {
  func.func @_residual_block_kernel(%arg0: i32, %arg1: i32, %arg2: memref<1x4x16xbf16, #tpu.memory_space<vmem>>, %arg3: memref<1x1x4x2xbf16, #tpu.memory_space<vmem>>, %arg4: memref<1x8x16xbf16, #tpu.memory_space<vmem>>, %arg5: memref<8x4xbf16, #tpu.memory_space<vmem>>, %arg6: memref<8x4xbf16, #tpu.memory_space<vmem>>, %arg7: memref<8x8xbf16, #tpu.memory_space<vmem>>, %arg8: memref<8x1xf32, #tpu.memory_space<vmem>>, %arg9: memref<4x4xbf16, #tpu.memory_space<vmem>>, %arg10: memref<4x1xf32, #tpu.memory_space<vmem>>, %arg11: memref<1x4x16xf32, #tpu.memory_space<vmem>>) attributes {dimension_semantics = [#tpu.dimension_semantics<parallel>, #tpu.dimension_semantics<parallel>], iteration_bounds = array<i64: 2, 1>, scalar_prefetch = 0 : i64, scratch_operands = 0 : i64, tpu.core_type = #tpu.core_type<tc>, window_params = [{transform_indices = @transform_0, window_bounds = array<i64: 1, 4, 16>}, {transform_indices = @transform_1, window_bounds = array<i64: 1, 1, 4, 2>}, {transform_indices = @transform_2, window_bounds = array<i64: 1, 8, 16>}, {pipeline_mode = #tpu.pipeline_mode<synchronous>, transform_indices = @transform_3, window_bounds = array<i64: 8, 4>}, {pipeline_mode = #tpu.pipeline_mode<synchronous>, transform_indices = @transform_4, window_bounds = array<i64: 8, 4>}, {pipeline_mode = #tpu.pipeline_mode<synchronous>, transform_indices = @transform_5, window_bounds = array<i64: 8, 8>}, {pipeline_mode = #tpu.pipeline_mode<synchronous>, transform_indices = @transform_6, window_bounds = array<i64: 8, 1>}, {pipeline_mode = #tpu.pipeline_mode<synchronous>, transform_indices = @transform_7, window_bounds = array<i64: 4, 4>}, {pipeline_mode = #tpu.pipeline_mode<synchronous>, transform_indices = @transform_8, window_bounds = array<i64: 4, 1>}, {transform_indices = @transform_9, window_bounds = array<i64: 1, 4, 16>}]} {
    %c0 = arith.constant 0 : index
    %c0_0 = arith.constant 0 : index
    %c0_1 = arith.constant 0 : index
    %0 = vector.load %arg2[%c0, %c0_0, %c0_1] : memref<1x4x16xbf16, #tpu.memory_space<vmem>>, vector<1x4x16xbf16>
    %1 = vector.shape_cast %0 : vector<1x4x16xbf16> to vector<4x16xbf16>
    %c0_2 = arith.constant 0 : index
    %c0_3 = arith.constant 0 : index
    %c0_4 = arith.constant 0 : index
    %c0_5 = arith.constant 0 : index
    %2 = vector.load %arg3[%c0_2, %c0_3, %c0_4, %c0_5] : memref<1x1x4x2xbf16, #tpu.memory_space<vmem>>, vector<1x1x4x2xbf16>
    %3 = vector.shape_cast %2 : vector<1x1x4x2xbf16> to vector<4x2xbf16>
    %c0_6 = arith.constant 0 : index
    %c0_7 = arith.constant 0 : index
    %c0_8 = arith.constant 0 : index
    %4 = vector.load %arg4[%c0_6, %c0_7, %c0_8] : memref<1x8x16xbf16, #tpu.memory_space<vmem>>, vector<1x8x16xbf16>
    %5 = vector.shape_cast %4 : vector<1x8x16xbf16> to vector<8x16xbf16>
    %6 = vector.extract_strided_slice %1 {offsets = [0, 0], sizes = [4, 14], strides = [1, 1]} : vector<4x16xbf16> to vector<4x14xbf16>
    %7 = tpu.concatenate %3, %6 in 1 : vector<4x2xbf16>, vector<4x14xbf16> -> vector<4x16xbf16>
    %c0_9 = arith.constant 0 : index
    %c0_10 = arith.constant 0 : index
    %8 = vector.load %arg8[%c0_9, %c0_10] : memref<8x1xf32, #tpu.memory_space<vmem>>, vector<8x1xf32>
    %c0_11 = arith.constant 0 : index
    %c0_12 = arith.constant 0 : index
    %9 = vector.load %arg5[%c0_11, %c0_12] : memref<8x4xbf16, #tpu.memory_space<vmem>>, vector<8x4xbf16>
    %cst = arith.constant dense<0.000000e+00> : vector<8x16xf32>
    %10 = tpu.matmul %9, %1, %cst {dimension_numbers = #tpu.dot_dimension_numbers<[1], [0], [0], [1], [0, 0, 1, 1], [], []>} : vector<8x4xbf16>, vector<4x16xbf16>, vector<8x16xf32> -> vector<8x16xf32>
    %11 = vector.broadcast %8 : vector<8x1xf32> to vector<8x16xf32>
    %12 = arith.addf %11, %10 : vector<8x16xf32>
    %c0_13 = arith.constant 0 : index
    %c0_14 = arith.constant 0 : index
    %13 = vector.load %arg6[%c0_13, %c0_14] : memref<8x4xbf16, #tpu.memory_space<vmem>>, vector<8x4xbf16>
    %cst_15 = arith.constant dense<0.000000e+00> : vector<8x16xf32>
    %14 = tpu.matmul %13, %7, %cst_15 {dimension_numbers = #tpu.dot_dimension_numbers<[1], [0], [0], [1], [0, 0, 1, 1], [], []>} : vector<8x4xbf16>, vector<4x16xbf16>, vector<8x16xf32> -> vector<8x16xf32>
    %15 = arith.addf %12, %14 : vector<8x16xf32>
    %c0_16 = arith.constant 0 : index
    %c0_17 = arith.constant 0 : index
    %16 = vector.load %arg7[%c0_16, %c0_17] : memref<8x8xbf16, #tpu.memory_space<vmem>>, vector<8x8xbf16>
    %cst_18 = arith.constant dense<0.000000e+00> : vector<8x16xf32>
    %17 = tpu.matmul %16, %5, %cst_18 {dimension_numbers = #tpu.dot_dimension_numbers<[1], [0], [0], [1], [0, 0, 1, 1], [], []>} : vector<8x8xbf16>, vector<8x16xbf16>, vector<8x16xf32> -> vector<8x16xf32>
    %18 = arith.addf %15, %17 : vector<8x16xf32>
    %19 = vector.extract_strided_slice %18 {offsets = [0, 0], sizes = [4, 16], strides = [1, 1]} : vector<8x16xf32> to vector<4x16xf32>
    %20 = vector.extract_strided_slice %18 {offsets = [4, 0], sizes = [4, 16], strides = [1, 1]} : vector<8x16xf32> to vector<4x16xf32>
    %21 = math.tanh %19 : vector<4x16xf32>
    %cst_19 = arith.constant 0.000000e+00 : f32
    %22 = vector.broadcast %cst_19 : f32 to vector<4x16xf32>
    %23 = arith.subf %22, %20 : vector<4x16xf32>
    %24 = math.exp %23 : vector<4x16xf32>
    %cst_20 = arith.constant 1.000000e+00 : f32
    %25 = vector.broadcast %cst_20 : f32 to vector<4x16xf32>
    %26 = arith.addf %25, %24 : vector<4x16xf32>
    %27 = tpu.reciprocal %26 {approx = true} : vector<4x16xf32> -> vector<4x16xf32>
    %28 = arith.mulf %21, %27 : vector<4x16xf32>
    %c0_21 = arith.constant 0 : index
    %c0_22 = arith.constant 0 : index
    %29 = vector.load %arg9[%c0_21, %c0_22] : memref<4x4xbf16, #tpu.memory_space<vmem>>, vector<4x4xbf16>
    %30 = arith.truncf %28 : vector<4x16xf32> to vector<4x16xbf16>
    %cst_23 = arith.constant dense<0.000000e+00> : vector<4x16xf32>
    %31 = tpu.matmul %29, %30, %cst_23 {dimension_numbers = #tpu.dot_dimension_numbers<[1], [0], [0], [1], [0, 0, 1, 1], [], []>} : vector<4x4xbf16>, vector<4x16xbf16>, vector<4x16xf32> -> vector<4x16xf32>
    %c0_24 = arith.constant 0 : index
    %c0_25 = arith.constant 0 : index
    %32 = vector.load %arg10[%c0_24, %c0_25] : memref<4x1xf32, #tpu.memory_space<vmem>>, vector<4x1xf32>
    %33 = vector.broadcast %32 : vector<4x1xf32> to vector<4x16xf32>
    %34 = arith.addf %31, %33 : vector<4x16xf32>
    %35 = arith.extf %1 : vector<4x16xbf16> to vector<4x16xf32>
    %36 = arith.addf %35, %34 : vector<4x16xf32>
    %c0_26 = arith.constant 0 : index
    %c0_27 = arith.constant 0 : index
    %c0_28 = arith.constant 0 : index
    %37 = vector.load %arg11[%c0_26, %c0_27, %c0_28] : memref<1x4x16xf32, #tpu.memory_space<vmem>>, vector<1x4x16xf32>
    %38 = vector.shape_cast %37 : vector<1x4x16xf32> to vector<4x16xf32>
    %39 = vector.shape_cast %36 : vector<4x16xf32> to vector<1x4x16xf32>
    tpu.vector_store %arg11[%c0_26, %c0_27, %c0_28], %39 {strides = array<i32>} : memref<1x4x16xf32, #tpu.memory_space<vmem>>, vector<1x4x16xf32>,
    return
  }
  func.func @transform_0(%arg0: i32, %arg1: i32) -> (i32, i32, i32) {
    %c0_i32 = arith.constant 0 : i32
    %c0_i32_0 = arith.constant 0 : i32
    return %arg0, %c0_i32, %arg1 : i32, i32, i32
  }
  func.func @transform_1(%arg0: i32, %arg1: i32) -> (i32, i32, i32, i32) {
    %c0_i32 = arith.constant 0 : i32
    %c0_i32_0 = arith.constant 0 : i32
    %c0_i32_1 = arith.constant 0 : i32
    return %arg0, %arg1, %c0_i32, %c0_i32_0 : i32, i32, i32, i32
  }
  func.func @transform_2(%arg0: i32, %arg1: i32) -> (i32, i32, i32) {
    %c0_i32 = arith.constant 0 : i32
    %c0_i32_0 = arith.constant 0 : i32
    return %arg0, %c0_i32, %arg1 : i32, i32, i32
  }
  func.func @transform_3(%arg0: i32, %arg1: i32) -> (i32, i32) {
    %c0_i32 = arith.constant 0 : i32
    %c0_i32_0 = arith.constant 0 : i32
    %c0_i32_1 = arith.constant 0 : i32
    return %c0_i32, %c0_i32_0 : i32, i32
  }
  func.func @transform_4(%arg0: i32, %arg1: i32) -> (i32, i32) {
    %c0_i32 = arith.constant 0 : i32
    %c0_i32_0 = arith.constant 0 : i32
    %c0_i32_1 = arith.constant 0 : i32
    return %c0_i32, %c0_i32_0 : i32, i32
  }
  func.func @transform_5(%arg0: i32, %arg1: i32) -> (i32, i32) {
    %c0_i32 = arith.constant 0 : i32
    %c0_i32_0 = arith.constant 0 : i32
    %c0_i32_1 = arith.constant 0 : i32
    return %c0_i32, %c0_i32_0 : i32, i32
  }
  func.func @transform_6(%arg0: i32, %arg1: i32) -> (i32, i32) {
    %c0_i32 = arith.constant 0 : i32
    %c0_i32_0 = arith.constant 0 : i32
    %c0_i32_1 = arith.constant 0 : i32
    return %c0_i32, %c0_i32_0 : i32, i32
  }
  func.func @transform_7(%arg0: i32, %arg1: i32) -> (i32, i32) {
    %c0_i32 = arith.constant 0 : i32
    %c0_i32_0 = arith.constant 0 : i32
    %c0_i32_1 = arith.constant 0 : i32
    return %c0_i32, %c0_i32_0 : i32, i32
  }
  func.func @transform_8(%arg0: i32, %arg1: i32) -> (i32, i32) {
    %c0_i32 = arith.constant 0 : i32
    %c0_i32_0 = arith.constant 0 : i32
    %c0_i32_1 = arith.constant 0 : i32
    return %c0_i32, %c0_i32_0 : i32, i32
  }
  func.func @transform_9(%arg0: i32, %arg1: i32) -> (i32, i32, i32) {
    %c0_i32 = arith.constant 0 : i32
    %c0_i32_0 = arith.constant 0 : i32
    return %arg0, %c0_i32, %arg1 : i32, i32, i32
  }
}

</mosaic_0001>

<bundles_post_ra>
// kernel: tpu_custom_call.1
= control target key start
LH: loop header
LB: loop body
LE: loop exit
PB: predicated region body
PF: predicated region fallthrough
CT: control target
= control target key end

     0   :  { %14 = vsyncpa [#allocation3], 0  ;;  %s1178_s0 = inlined_call_operand.vmem [shape: bf16[2,4,16], index: 0, kind: input, shape index: {}]   ;;  %s1179_s1 = inlined_call_operand.vmem [shape: bf16[2,1,4,2], index: 1, kind: input, shape index: {}]   ;;  %s1180_s2 = inlined_call_operand.vmem [shape: bf16[2,8,16], index: 2, kind: input, shape index: {}]   ;;  %s1181_s3 = inlined_call_operand.vmem [shape: bf16[8,4], index: 3, kind: input, shape index: {}]   ;;  %s1182_s4 = inlined_call_operand.vmem [shape: bf16[8,4], index: 4, kind: input, shape index: {}]   ;;  %s1183_s5 = inlined_call_operand.vmem [shape: bf16[8,8], index: 5, kind: input, shape index: {}]   ;;  %s1184_s6 = inlined_call_operand.vmem [shape: f32[8,1], index: 6, kind: input, shape index: {}]   ;;  %s1185_s7 = inlined_call_operand.vmem [shape: bf16[4,4], index: 7, kind: input, shape index: {}]   ;;  %s1186_s8 = inlined_call_operand.vmem [shape: f32[4,1], index: 8, kind: input, shape index: {}]   ;;  %s1187_s9 = inlined_call_operand.hbm [shape: f32[2,4,16], index: 9, kind: output, shape index: {}]  }
   0x1   :  { %16 = vsyncpa [#allocation3 + $0x1], 0  ;;  %s1023_s30 = smov 0   ;;  %s1025_s10 = smov 0  }
   0x2   :  { %s1027_s11 = smov 0   ;;  %s1029_s12 = smov 0  }
   0x3   :  { %s1031_s13 = smov 0   ;;  %s1033_s14 = smov 0  }
   0x4 LB: > { %s764_s15 = sadd.s32 4294967295, %s965_s14   ;;  %s765_s16 = sadd.s32 4294967294, %s965_s14   ;;  %s965_s14 = sphi %s1033_s14, %s22_s14   ;;  %s961_s13 = sphi %s1031_s13, %s1194_s13   ;;  %s957_s12 = sphi %s1029_s12, %s1193_s12   ;;  %s953_s11 = sphi %s1027_s11, %s1192_s11   ;;  %s949_s10 = sphi %s1025_s10, %s1191_s10   ;;  %s945_s30 = sphi %s1023_s30, %s1190_s30  }
   0x5   : > { %s34_s17 = sadd.s32 1, %s961_s13  ;;  %s253_s18 = sadd.s32 1, %s953_s11 }
   0x6   : > { %p36_p0 = scmp.ge.s32.totalorder %s34_s17, 2  ;;  %p263_p1 = scmp.ne.s32.totalorder %s953_s11, %s949_s10 }
   0x7   : > { %p264_p2 = scmp.eq.s32.totalorder %s764_s15, 1  ;;  %p269_p3 = scmp.ne.s32.totalorder %s949_s10, %s945_s30 }
   0x8   : > { %s1196_s17 = smov (%p36_p0, %s34_s17), 0  ;;  %p270_p5 = scmp.eq.s32.totalorder %s765_s16, 1 }
   0x9   : > { %p1063_p4 = por %p264_p2, %p263_p1  ;;  %s248_s20 = ssub.s32 %s961_s13, %s1196_s17 }
   0xa   : > { %p768_p6 = scmp.ge.s32.totalorder %s965_s14, 1  ;;  %p251_p7 = scmp.eq.s32.totalorder %s248_s20, 0 }
   0xb   : > { %p1070_p8 = por %p270_p5, %p269_p3  ;;  %p336_p9 = scmp.lt.s32.totalorder %s965_s14, 3 }
   0xc   : > { %s1076_s22 = scalar_select %p251_p7, %s953_s11, %s253_s18  }
   0xd   : > { %p337_p10 = pnand %p768_p6, %p336_p9 }
   0xe   : > { %p388_p11 = scmp.lt.s32.totalorder (!%p337_p10), %s957_s12, 1  ;;  %v417_v0 = vlaneseq (!%p337_p10)  ;;  %v967_v1 = vmov (!%p337_p10), 1983009808   ;;  %v968_v3 = vmov (!%p337_p10), 0.0   ;;  %vm969_vm0 = vmmov (!%p337_p10), 0   ;;  %s970_s15 = smov (!%p337_p10), 2  }
   0xf   : > { %340 = sbr.rel (%p337_p10) target bundleno = 643 (0x283), region = 56  ;;  %v415_v2 = vunpack.c.l.s4 (!%p337_p10), %v967_v1  ;;  %795 = vmatprep.subr.bf16.mxu0 (!%p337_p10), %v968_v3  ;;  %789 = vmatprep.subr.bf16.mxu1 (!%p337_p10), %v968_v3  ;;  %vm433_vm1 = vcmask (!%p337_p10), 1041408   ;;  %v428_v10 = vld [vmem:[%s1181_s3] sm:$0xf] (!%p337_p10)  ;;  %vm429_vm2 = vcmask (!%p337_p10), 31744   ;;  %v971_v12 = vmov (!%p337_p10), 0  }
  0x10   : > { %v418_v4 = vshrl.u32 (!%p337_p10), %v417_v0, 7  ;;  %797 = vmatprep.mubr.msk.bf16.mxu0 (!%p337_p10), %vm969_vm0, %v968_v3  ;;  %791 = vmatprep.mubr.msk.bf16.mxu1 (!%p337_p10), %vm969_vm0, %v968_v3  ;;  %v427_v11 = vld [vmem:[%s1184_s6] sm:$0xff] (!%p337_p10)  ;;  %vm423_vm3 = vcmask (!%p337_p10), 15360   ;;  %vm535_vm4 = vcmask (!%p337_p10), 1043456   ;;  %vm531_vm5 = vcmask (!%p337_p10), 64512   ;;  %s385_s28 = sand.u32 (!%p337_p10), 1, %s949_s10  }
  0x11   : > { %v416_v5 = vunpack.c.0.s8 (!%p337_p10), %v415_v2  ;;  %879 = vset.pattern.permute.xlu0 (!%p337_p10), %v971_v12  ;;  %880 = vset.pattern.permute.xlu1 (!%p337_p10), %v971_v12  ;;  %v483_v18 = vld [vmem:[%s1182_s4] sm:$0xf] (!%p337_p10)  ;;  %s769_s29 = sshll.u32 (!%p337_p10), %s385_s28, 2  ;;  %vm646_vm6 = vcmask (!%p337_p10), 125952  }
  0x12   : > { %v530_v20 = vld [vmem:[%s1183_s5] sm:$0xf] (!%p337_p10)  ;;  %s387_s16 = scalar_lea.vmem (!%p337_p10), [#allocation2], %s769_s29 }
  0x13   : > { %v419_v6 = vsub.s32 (!%p337_p10), %v416_v5, %v418_v4  ;;  %v592_v25 = vld [vmem:[%s1186_s8] sm:$0xf] (!%p337_p10)  ;;  %s663_s18 = sshll.u32 (!%p337_p10), %s387_s16, 4  ;;  %s1133_s18 = int_to_ptr.vmem [resolvable:$true] %s663_s18 }
  0x14   : > { %595 = vperm.xlu1 (!%p337_p10), %880, %v592_v25   ;;  %v590_v43 = vld [vmem:[%s1185_s7] sm:$0x3] (!%p337_p10)  ;;  %s887_s25 = scalar_lea.vmem (!%p337_p10), %s1133_s18, 64 }
  0x15   : > { %p888_p12 = scmp.ne.s32.totalorder (!%p337_p10), %s1133_s18, %s887_s25 }
  0x16   : > { %s1080_s23 = scalar_select %p388_p11, %s957_s12, 1 }
  0x17   : > { %p889_p13 = pnand %p888_p12, %p1063_p4 }
  0x18   : > { %s770_s24 = sshll.u32 %s1080_s23, 1 }
  0x19   : > { %s394_s27 = scalar_lea.vmem %s1178_s0, %s770_s24  ;;  %s401_s26 = scalar_lea.vmem %s1179_s1, %s770_s24 }
  0x1a   : > { %v1088_v7 = vld [vmem:[%s394_s27] sm:$0x3]  ;;  %s772_s27 = sshll.u32 %s1080_s23, 2  ;;  %p890_p0 = pneg %p889_p13 }
  0x1b   : > { %v420_v8 = vrot.slane %v1088_v7, %v419_v6  ;;  %v435_v9 = vsel %vm433_vm1, %v1088_v7, 0  ;;  %v411_v13 = vld [vmem:[%s401_s26] sm:$0x3]  ;;  %v644_v45 = vunpack.c.l.bf16 %v1088_v7  ;;  %s972_s26 = smov [#allocation2]  }
  0x1c   : > { %790 = vmatpush3.bf16.msra.mxu1 %v435_v9 }
  0x1d   : > { %421 = vrot.lane.b32.xlu0 %v420_v8, %s970_s15  ;;  %807 = vmatprep.subr.bf16.mxu1 %v968_v3  ;;  %s408_s15 = scalar_lea.vmem %s1180_s2, %s772_s27  ;;  %s891_s27 = sshll.u32 %s972_s26, 4  ;;  %s892_s27 = int_to_ptr.vmem [resolvable:$false] %s891_s27 }
  0x1e   : > { %v412_v16 = vld [vmem:[%s408_s15] sm:$0xf]  ;;  %s778_s15 = sshll.u32 %s957_s12, 6  ;;  %s649_s12 = scalar_lea.sflag [#allocation3], %s385_s28 }
  0x1f   : > { %792 = vmatmul.mubr.msk.bf16.vlgmr.msra.gmra.mrb[0].mxu1 %vm429_vm2, %v428_v10  ;;  %v537_v19 = vsel %vm535_vm4, %v412_v16, 0  ;;  %s1131_s20 = scalar_lea.hbm %s1187_s9, %s778_s15  ;;  %s893_s29 = scalar_lea.vmem %s892_s27, 128 }
  0x20   : > { %809 = vmatprep.mubr.msk.bf16.mxu1 %vm969_vm0, %v968_v3  ;;  %p894_p1 = scmp.lt.s32.totalorder %s1133_s18, %s892_s27  ;;  %p895_p2 = scmp.lt.s32.totalorder %s893_s29, %s887_s25 }
  0x21   : > { %479 = vperm.xlu0 %879, %v427_v11  }
  0x22   : > { %p896_p3 = por %p895_p2, %p894_p1 }
  0x24   : > { %p897_p5 = pnand %p896_p3, %p890_p0 }
  0x8f   : > { %v422_v14 = vpop.permute.xlu0 %421 }
  0x90   : > { %v426_v15 = vsel %vm423_vm3, %v411_v13, %v422_v14 }
  0x91   : > { %v487_v17 = vsel %vm433_vm1, %v426_v15, 0 }
  0x92   : > { %796 = vmatpush3.bf16.msra.mxu0 %v487_v17 }
  0x93   : > { %801 = vmatprep.subr.bf16.mxu0 %v968_v3  ;;  %v596_v44 = vpop.permute.xlu1 %595 }
  0x95   : > { %798 = vmatmul.mubr.msk.bf16.vlgmr.msra.gmra.mrb[0].mxu0 %vm429_vm2, %v483_v18 }
  0x96   : > { %802 = vmatpush3.bf16.msra.mxu0 %v537_v19  ;;  %803 = vmatprep.mubr.msk.bf16.mxu0 %vm969_vm0, %v968_v3 }
  0xa0   : > { %v480_v26 = vpop.permute.xlu0 %479 }
  0xa1   : > { %804 = vmatmul.mubr.msk.bf16.vlgmr.msra.gmra.mrb[0].mxu0 %vm531_vm5, %v530_v20 }
  0xf2   : > { %v471_v21 = vpop.f32.mrb[0].mxu1 }
  0xf3   : > { %v793_v22 = vpop.f32.mrb[1].mxu1  ;;  %v482_v27 = vadd.f32 %v480_v26, %v471_v21 }
  0xf4   : > { %v474_v23 = vpop.f32.mrb[2].mxu1 }
  0xf5   : > { %v794_v24 = vpop.f32.mrb[3].mxu1 }
 0x174   : > { %v573_v28 = vpop.f32.mrb[0].mxu0 }
 0x175   : > { %v814_v29 = vadd.f32 %v573_v28, %v482_v27  ;;  %v805_v30 = vpop.f32.mrb[1].mxu0 }
 0x176   : > { %v576_v31 = vpop.f32.mrb[2].mxu0 }
 0x177   : > { %v581_v32 = vsub.f32 0.0, %v814_v29  ;;  %v806_v33 = vpop.f32.mrb[3].mxu0 }
 0x179   : > { %v582_v34 = vmul.f32 1.442695, %v581_v32 }
 0x17b   : > { %881 = vpow2.f32 %v582_v34 }
 0x185   : > { %v882_v35 = vpop.eup %881 }
 0x186   : > { %v584_v36 = vadd.f32 1.0, %v882_v35 }
 0x188   : > { %883 = vrcp.f32 %v584_v36 }
 0x189   : > { %885 = vtanh.f32 %v814_v29 }
 0x192   : > { %v884_v37 = vpop.eup %883 }
 0x193   : > { %v587_v38 = vrot.slane %v884_v37, 4  ;;  %v886_v39 = vpop.eup %885 }
 0x195   : > { %v589_v40 = vmul.f32 %v886_v39, %v587_v38 }
 0x197   : > { %v591_v41 = vpack.c.bf16 %v589_v40, %v589_v40 }
 0x199   : > { %v602_v42 = vsel %vm433_vm1, %v591_v41, 0 }
 0x19a   : > { %808 = vmatpush3.bf16.msra.mxu1 %v602_v42 }
 0x19d   : > { %810 = vmatmul.mubr.msk.bf16.vlgmr.msra.gmra.mrb[4].mxu1 %vm429_vm2, %v590_v43 }
 0x270   : > { %v638_v46 = vpop.f32.mrb[4].mxu1 }
 0x271   : > { %v811_v47 = vpop.f32.mrb[5].mxu1  ;;  %v639_v48 = vadd.f32 %v638_v46, %v596_v44 }
 0x272   : > { %v641_v49 = vpop.f32.mrb[6].mxu1 }
 0x273   : > { %v645_v50 = vadd.f32 %v644_v45, %v639_v48  ;;  %v812_v51 = vpop.f32.mrb[7].mxu1 }
 0x275   : > { %647 = vst.msk [vmem:[%s387_s16] sm:$0xf] %vm646_vm6, %v645_v50 }
 0x276   : > { %900 = shalt.err (!%p897_p5)
}
 0x277   : > { %s901_s28 = scalar_lea.hbm %s1131_s20, 64  ;;  %s905_s23 = scalar_lea.hbm %s1187_s9, 128 }
 0x278   : > { %p902_p6 = scmp.ne.s32.totalorder %s1131_s20, %s901_s28  ;;  %p906_p10 = scmp.lt.u32.totalorder %s1131_s20, %s1187_s9 }
 0x279   : > { %p907_p11 = scmp.lt.u32.totalorder %s905_s23, %s901_s28  ;;  %p909_p13 = scmp.lt.u32.totalorder %s901_s28, %s1131_s20 }
 0x27a   : > { %p903_p7 = pnand %p902_p6, %p1063_p4 }
 0x27b   : > { %p908_p12 = por %p907_p11, %p906_p10 }
 0x27c   : > { %p904_p9 = pneg %p903_p7 }
 0x27d   : > { %p910_p0 = por %p909_p13, %p908_p12 }
 0x27f   : > { %p911_p1 = pnand %p910_p0, %p904_p9 }
 0x281   : > { %914 = shalt.err (!%p911_p1)
}
 0x282   : > { %819 = dma.vmem_to_hbm [thread:$0]  (%p1063_p4), %s1133_s18, 64, %s1131_s20, %s649_s12  }
 0x283 PF: > { %p825_p2 = scmp.ge.s32.totalorder %s965_s14, 2  ;;  %s675_s25 = sand.u32 1, %s945_s30  }
 0x284   : > { %s676_s27 = scalar_lea.sflag [#allocation3], %s675_s25 }
 0x285   : > { %p822_p3 = pnand %p825_p2, %p1070_p8 }
 0x287   : > { %940 = dma.done.wait (!%p822_p3), %s676_s27, 64  }
 0x288   : > { %942 = vsyncadd (!%p822_p3), %s676_s27, 4294967232  ;;  %s22_s14 = sadd.s32 1, %s965_s14   ;;  %s1190_s30 = smov %s949_s10 }
 0x289   : > { %p19_p5 = scmp.ge.s32.totalorder %s22_s14, 4   ;;  %s1191_s10 = smov %s953_s11 }
 0x28a   : > { %s1192_s11 = smov %s1076_s22  ;;  %s1193_s12 = smov %s961_s13 }
 0x28b   : > { %s1194_s13 = smov %s1196_s17  ;;  %21 = sbr.rel (!%p19_p5) target bundleno = 4 (0x4), region = 97 }
 0x292   :  { %681 = vsyncpa [#allocation3], 1 }
 0x293   :  { %683 = vsyncpa [#allocation3 + $0x1], 1 }

</bundles_post_ra>
